<compile_context>
chip_gen: v5e
topology: v5e:2x2
jax: 0.10.0
libtpu: 0.0.40
codegen_flags: <defaults>
</compile_context>

<pallas_src>
import itertools

import numpy as np

import jax
import jax.numpy as jnp
from jax.experimental import pallas as pl
from jax.experimental.pallas import tpu as pltpu


def _make_basis64():
    """(64, 64) IDCT basis with alpha and the 0.25 factor folded in.

    basis[x*8+y, u*8+v] = 0.25 * alpha[x] * alpha[y]
                          * cos((2u+1)x*pi/16) * cos((2v+1)y*pi/16)
    so that  out_flat = dcp_flat @ basis + 128  matches the torch module.
    """
    alpha = np.array([1.0 / np.sqrt(2.0)] + [1.0] * 7, dtype=np.float64)
    alpha2 = np.outer(alpha, alpha)
    t = np.zeros((8, 8, 8, 8), dtype=np.float64)
    for x, y, u, v in itertools.product(range(8), repeat=4):
        t[x, y, u, v] = (np.cos((2 * u + 1) * x * np.pi / 16.0)
                         * np.cos((2 * v + 1) * y * np.pi / 16.0))
    basis = 0.25 * alpha2[:, :, None, None] * t
    return basis.reshape(64, 64).astype(np.float32)


_BASIS64 = _make_basis64()

# Pack 2 independent 8x8 blocks per matmul row -> 128-wide lane-dense tiles and
# a 128x128 (block-diagonal) MXU contraction.
_GROUP = 2
_BASIS128 = np.zeros((_GROUP * 64, _GROUP * 64), dtype=np.float32)
for _g in range(_GROUP):
    _BASIS128[_g * 64:(_g + 1) * 64, _g * 64:(_g + 1) * 64] = _BASIS64


def _idct_kernel(x_ref, b_ref, o_ref):
    # (tm, 128) @ (128, 128) on the MXU with f32 accumulate; +128 bias fused
    # into the store. Input and output tiles are lane-dense (last dim 128).
    o_ref[...] = jnp.dot(x_ref[...], b_ref[...],
                         preferred_element_type=jnp.float32) + 128.0


def _round_up(a, b):
    return (a + b - 1) // b * b


def idct8x8(dcp, *, tm_max=2048):
    """Pallas equivalent of IDCT8x8.forward: (B, 8, 8) -> (B, 8, 8)."""
    B = dcp.shape[0]
    assert dcp.shape[1:] == (8, 8), dcp.shape
    out_dtype = dcp.dtype

    # Flatten each 8x8 block into a 64-vector (row-major: index x*8 + y).
    x = dcp.reshape(B, 64).astype(jnp.float32)

    # Pack _GROUP blocks per row so the kernel sees a 128-wide lane dimension.
    # (Only pads when B is odd; the reshape itself is a free bitcast.)
    bp = _round_up(max(B, 1), _GROUP)
    if bp != B:
        x = jnp.pad(x, ((0, bp - B), (0, 0)))
    m = bp // _GROUP
    x = x.reshape(m, _GROUP * 64)

    # Tile the row dimension. Rows that spill past m in the last grid step are
    # handled by Pallas (padded reads, masked writes), so no XLA-side pad/slice
    # copies are needed for ragged row counts.
    tm = min(tm_max, _round_up(m, 8))
    grid = pl.cdiv(m, tm)

    basis = jnp.asarray(_BASIS128)

    out = pl.pallas_call(
        _idct_kernel,
        out_shape=jax.ShapeDtypeStruct((m, _GROUP * 64), jnp.float32),
        grid_spec=pltpu.PrefetchScalarGridSpec(
            num_scalar_prefetch=0,
            grid=(grid,),
            in_specs=[
                # Row tile of packed DCT coefficients (fully contiguous chunk).
                pl.BlockSpec((tm, _GROUP * 64), lambda i: (i, 0)),
                # Constant basis: same block every step -> stays resident.
                pl.BlockSpec((_GROUP * 64, _GROUP * 64), lambda i: (0, 0)),
            ],
            out_specs=pl.BlockSpec((tm, _GROUP * 64), lambda i: (i, 0)),
        ),
        compiler_params=pltpu.CompilerParams(
            dimension_semantics=("parallel",),
        ),
    )(x, basis)

    # Unpack: split packed pairs, drop the (rare) odd-batch padding block.
    out = out.reshape(bp, 64)[:B].reshape(B, 8, 8)
    return out.astype(out_dtype)


def _reference(dcp):
    """Pure-JAX reference matching the torch module exactly."""
    alpha = np.array([1.0 / np.sqrt(2.0)] + [1.0] * 7)
    alpha2 = jnp.asarray(np.outer(alpha, alpha).astype(np.float32))
    t = np.zeros((8, 8, 8, 8), dtype=np.float32)
    for x, y, u, v in itertools.product(range(8), repeat=4):
        t[x, y, u, v] = (np.cos((2 * u + 1) * x * np.pi / 16.0)
                         * np.cos((2 * v + 1) * y * np.pi / 16.0))
    t = jnp.asarray(t)
    return 0.25 * jnp.tensordot(dcp * alpha2, t, axes=2) + 128.0


if __name__ == "__main__":
    key = jax.random.PRNGKey(0)

    # Batch of 8x8 DCT-coefficient blocks, matching the module's forward
    # signature (batch x height(8) x width(8)).
    dcp = jax.random.normal(key, (256, 8, 8), dtype=jnp.float32) * 16.0
    out = jax.block_until_ready(idct8x8(dcp))
    ref = jax.block_until_ready(_reference(dcp))
    assert out.shape == dcp.shape, out.shape
    max_err = float(jnp.max(jnp.abs(out - ref)))
    assert jnp.allclose(out, ref, rtol=1e-4, atol=1e-3), max_err

    # Ragged batch: exercises odd-batch packing and the masked last grid step.
    dcp2 = jax.random.normal(jax.random.PRNGKey(1), (37, 8, 8),
                             dtype=jnp.float32) * 16.0
    out2 = jax.block_until_ready(idct8x8(dcp2))
    ref2 = jax.block_until_ready(_reference(dcp2))
    assert out2.shape == dcp2.shape, out2.shape
    max_err2 = float(jnp.max(jnp.abs(out2 - ref2)))
    assert jnp.allclose(out2, ref2, rtol=1e-4, atol=1e-3), max_err2

    print("KERNEL_OK")
</pallas_src>

<mosaic_0001>
module attributes {stable_mosaic.version = 11 : i64} {
  func.func @_idct_kernel(%arg0: i32, %arg1: memref<128x128xf32, #tpu.memory_space<vmem>>, %arg2: memref<128x128xf32, #tpu.memory_space<vmem>>, %arg3: memref<128x128xf32, #tpu.memory_space<vmem>>) attributes {dimension_semantics = [#tpu.dimension_semantics<parallel>], iteration_bounds = array<i64: 1>, scalar_prefetch = 0 : i64, scratch_operands = 0 : i64, tpu.core_type = #tpu.core_type<tc>, window_params = [{transform_indices = @transform_0, window_bounds = array<i64: 128, 128>}, {pipeline_mode = #tpu.pipeline_mode<synchronous>, transform_indices = @transform_1, window_bounds = array<i64: 128, 128>}, {transform_indices = @transform_2, window_bounds = array<i64: 128, 128>}]} {
    %c0 = arith.constant 0 : index
    %c0_0 = arith.constant 0 : index
    %0 = vector.load %arg1[%c0, %c0_0] : memref<128x128xf32, #tpu.memory_space<vmem>>, vector<128x128xf32>
    %c0_1 = arith.constant 0 : index
    %c0_2 = arith.constant 0 : index
    %1 = vector.load %arg2[%c0_1, %c0_2] : memref<128x128xf32, #tpu.memory_space<vmem>>, vector<128x128xf32>
    %cst = arith.constant dense<0.000000e+00> : vector<128x128xf32>
    %2 = tpu.matmul %0, %1, %cst {dimension_numbers = #tpu.dot_dimension_numbers<[1], [0], [0], [1], [0, 0, 1, 1], [], []>} : vector<128x128xf32>, vector<128x128xf32>, vector<128x128xf32> -> vector<128x128xf32>
    %cst_3 = arith.constant 1.280000e+02 : f32
    %3 = vector.broadcast %cst_3 : f32 to vector<128x128xf32>
    %4 = arith.addf %2, %3 : vector<128x128xf32>
    %c0_4 = arith.constant 0 : index
    %c0_5 = arith.constant 0 : index
    %5 = vector.load %arg3[%c0_4, %c0_5] : memref<128x128xf32, #tpu.memory_space<vmem>>, vector<128x128xf32>
    tpu.vector_store %arg3[%c0_4, %c0_5], %4 {strides = array<i32>} : memref<128x128xf32, #tpu.memory_space<vmem>>, vector<128x128xf32>,
    return
  }
  func.func @transform_0(%arg0: i32) -> (i32, i32) {
    %c0_i32 = arith.constant 0 : i32
    %c0_i32_0 = arith.constant 0 : i32
    return %arg0, %c0_i32 : i32, i32
  }
  func.func @transform_1(%arg0: i32) -> (i32, i32) {
    %c0_i32 = arith.constant 0 : i32
    %c0_i32_0 = arith.constant 0 : i32
    %c0_i32_1 = arith.constant 0 : i32
    return %c0_i32, %c0_i32_0 : i32, i32
  }
  func.func @transform_2(%arg0: i32) -> (i32, i32) {
    %c0_i32 = arith.constant 0 : i32
    %c0_i32_0 = arith.constant 0 : i32
    return %arg0, %c0_i32 : i32, i32
  }
}

</mosaic_0001>

<bundles_post_ra>
// kernel: tpu_custom_call.1
= control target key start
LH: loop header
LB: loop body
LE: loop exit
PB: predicated region body
PF: predicated region fallthrough
CT: control target
= control target key end

     0   :  { %7 = vsyncpa [#allocation3], 0  ;;  %s346_s0 = inlined_call_operand.hbm [shape: f32[128,128], index: 0, kind: input, shape index: {}]   ;;  %s347_s1 = inlined_call_operand.hbm [shape: f32[128,128], index: 1, kind: input, shape index: {}]   ;;  %s348_s2 = inlined_call_operand.hbm [shape: f32[128,128], index: 2, kind: output, shape index: {}]  }
   0x1   :  { %8 = vsyncpa [#allocation6], 0 }
   0x2   :  { %9 = vsyncpa [#allocation4], 0  ;;  %s14_s11 = sshll.u32 %s346_s0, 4  ;;  %s308_s12 = smov [#allocation2]   ;;  %s15_s11 = int_to_ptr.hbm [resolvable:$true] %s14_s11 }
   0x3   :  { %s16_s13 = sshll.u32 %s308_s12, 4  ;;  %s27_s16 = sshll.u32 %s347_s1, 4  ;;  %s17_s13 = int_to_ptr.vmem [resolvable:$true] %s16_s13  ;;  %s28_s16 = int_to_ptr.hbm [resolvable:$true] %s27_s16 }
   0x4   :  { %s309_s17 = smov 128   ;;  %s310_s18 = smov 8  }
   0x5   :  { %22 = dma.hbm_to_vmem [thread:$0]  %s15_s11, 2048, %s17_s13, [#allocation3], %s309_s17, %s309_s17, %s310_s18  }
   0x6   :  { %s311_s19 = smov [#allocation5]  }
   0x7   :  { %s29_s20 = sshll.u32 %s311_s19, 4  ;;  %s30_s20 = int_to_ptr.vmem [resolvable:$true] %s29_s20 }
   0x8   :  { %35 = dma.hbm_to_vmem [thread:$0]  %s28_s16, 2048, %s30_s20, [#allocation6], %s309_s17, %s309_s17, %s310_s18  }
   0x9   :  { %302 = dma.done.wait [#allocation3], 2048  }
   0xa   :  { %303 = vsyncadd [#allocation3], 4294965248 }
   0xb   :  { %304 = dma.done.wait [#allocation6], 2048  }
   0xc   :  { %305 = vsyncadd [#allocation6], 4294965248  ;;  %v75_v0 = vld [vmem:[#allocation5 + $0x78] sm:$0xff]  ;;  %v74_v1 = vld [vmem:[#allocation5 + $0x70] sm:$0xff]  ;;  %s312_s0 = smov [#allocation7]   ;;  %s163_s23 = sshll.u32 %s348_s2, 4  ;;  %s164_s23 = int_to_ptr.hbm [resolvable:$true] %s163_s23 }
   0xd   :  { %178 = vmatpush.msra.mxu2 %v75_v0  ;;  %179 = vmatpush.msra.mxu3 %v75_v0  ;;  %v73_v2 = vld [vmem:[#allocation5 + $0x68] sm:$0xff]  ;;  %v72_v3 = vld [vmem:[#allocation5 + $0x60] sm:$0xff]  ;;  %v71_v4 = vld [vmem:[#allocation5 + $0x58] sm:$0xff]  ;;  %s161_s1 = sshll.u32 %s312_s0, 4  ;;  %s162_s1 = int_to_ptr.vmem [resolvable:$true] %s161_s1 }
   0xe   :  { %76 = vmatpush.msra.mxu0 %v75_v0  ;;  %177 = vmatpush.msra.mxu1 %v75_v0  ;;  %v70_v5 = vld [vmem:[#allocation5 + $0x50] sm:$0xff]  ;;  %v69_v6 = vld [vmem:[#allocation5 + $0x48] sm:$0xff]  ;;  %v68_v7 = vld [vmem:[#allocation5 + $0x40] sm:$0xff] }
   0xf   :  { %181 = vmatpush.msra.mxu2 %v74_v1  ;;  %182 = vmatpush.msra.mxu3 %v74_v1  ;;  %v67_v8 = vld [vmem:[#allocation5 + $0x38] sm:$0xff]  ;;  %v66_v9 = vld [vmem:[#allocation5 + $0x30] sm:$0xff]  ;;  %v65_v10 = vld [vmem:[#allocation5 + $0x28] sm:$0xff] }
  0x10   :  { %77 = vmatpush.msra.mxu0 %v74_v1  ;;  %180 = vmatpush.msra.mxu1 %v74_v1  ;;  %v64_v11 = vld [vmem:[#allocation5 + $0x20] sm:$0xff]  ;;  %v63_v12 = vld [vmem:[#allocation5 + $0x18] sm:$0xff]  ;;  %v62_v13 = vld [vmem:[#allocation5 + $0x10] sm:$0xff] }
  0x11   :  { %184 = vmatpush.msra.mxu2 %v73_v2  ;;  %185 = vmatpush.msra.mxu3 %v73_v2  ;;  %v61_v14 = vld [vmem:[#allocation5 + $0x8] sm:$0xff]  ;;  %v60_v15 = vld [vmem:[#allocation5] sm:$0xff]  ;;  %v54_v24 = vld [vmem:[#allocation2 + $0x50] sm:$0xff] }
  0x12   :  { %78 = vmatpush.msra.mxu0 %v73_v2  ;;  %183 = vmatpush.msra.mxu1 %v73_v2  ;;  %v52_v16 = vld [vmem:[#allocation2 + $0x40] sm:$0xff]  ;;  %v53_v20 = vld [vmem:[#allocation2 + $0x48] sm:$0xff]  ;;  %v58_v25 = vld [vmem:[#allocation2 + $0x70] sm:$0xff] }
  0x13   :  { %187 = vmatpush.msra.mxu2 %v72_v3  ;;  %188 = vmatpush.msra.mxu3 %v72_v3  ;;  %v56_v17 = vld [vmem:[#allocation2 + $0x60] sm:$0xff]  ;;  %v57_v21 = vld [vmem:[#allocation2 + $0x68] sm:$0xff]  ;;  %v46_v26 = vld [vmem:[#allocation2 + $0x10] sm:$0xff] }
  0x14   :  { %79 = vmatpush.msra.mxu0 %v72_v3  ;;  %186 = vmatpush.msra.mxu1 %v72_v3  ;;  %v44_v18 = vld [vmem:[#allocation2] sm:$0xff]  ;;  %v45_v22 = vld [vmem:[#allocation2 + $0x8] sm:$0xff]  ;;  %v50_v27 = vld [vmem:[#allocation2 + $0x30] sm:$0xff] }
  0x15   :  { %190 = vmatpush.msra.mxu2 %v71_v4  ;;  %191 = vmatpush.msra.mxu3 %v71_v4  ;;  %v48_v19 = vld [vmem:[#allocation2 + $0x20] sm:$0xff]  ;;  %v49_v23 = vld [vmem:[#allocation2 + $0x28] sm:$0xff]  ;;  %v55_v28 = vld [vmem:[#allocation2 + $0x58] sm:$0xff] }
  0x16   :  { %80 = vmatpush.msra.mxu0 %v71_v4  ;;  %189 = vmatpush.msra.mxu1 %v71_v4  ;;  %v59_v29 = vld [vmem:[#allocation2 + $0x78] sm:$0xff] }
  0x17   :  { %193 = vmatpush.msra.mxu2 %v70_v5  ;;  %194 = vmatpush.msra.mxu3 %v70_v5  ;;  %v47_v30 = vld [vmem:[#allocation2 + $0x18] sm:$0xff] }
  0x18   :  { %81 = vmatpush.msra.mxu0 %v70_v5  ;;  %192 = vmatpush.msra.mxu1 %v70_v5  ;;  %v51_v31 = vld [vmem:[#allocation2 + $0x38] sm:$0xff] }
  0x19   :  { %196 = vmatpush.msra.mxu2 %v69_v6  ;;  %197 = vmatpush.msra.mxu3 %v69_v6 }
  0x1a   :  { %82 = vmatpush.msra.mxu0 %v69_v6  ;;  %195 = vmatpush.msra.mxu1 %v69_v6 }
  0x1b   :  { %199 = vmatpush.msra.mxu2 %v68_v7  ;;  %200 = vmatpush.msra.mxu3 %v68_v7 }
  0x1c   :  { %83 = vmatpush.msra.mxu0 %v68_v7  ;;  %198 = vmatpush.msra.mxu1 %v68_v7 }
  0x1d   :  { %202 = vmatpush.msra.mxu2 %v67_v8  ;;  %203 = vmatpush.msra.mxu3 %v67_v8 }
  0x1e   :  { %84 = vmatpush.msra.mxu0 %v67_v8  ;;  %201 = vmatpush.msra.mxu1 %v67_v8 }
  0x1f   :  { %205 = vmatpush.msra.mxu2 %v66_v9  ;;  %206 = vmatpush.msra.mxu3 %v66_v9 }
  0x20   :  { %85 = vmatpush.msra.mxu0 %v66_v9  ;;  %204 = vmatpush.msra.mxu1 %v66_v9 }
  0x21   :  { %208 = vmatpush.msra.mxu2 %v65_v10  ;;  %209 = vmatpush.msra.mxu3 %v65_v10 }
  0x22   :  { %86 = vmatpush.msra.mxu0 %v65_v10  ;;  %207 = vmatpush.msra.mxu1 %v65_v10 }
  0x23   :  { %211 = vmatpush.msra.mxu2 %v64_v11  ;;  %212 = vmatpush.msra.mxu3 %v64_v11 }
  0x24   :  { %87 = vmatpush.msra.mxu0 %v64_v11  ;;  %210 = vmatpush.msra.mxu1 %v64_v11 }
  0x25   :  { %214 = vmatpush.msra.mxu2 %v63_v12  ;;  %215 = vmatpush.msra.mxu3 %v63_v12 }
  0x26   :  { %88 = vmatpush.msra.mxu0 %v63_v12  ;;  %213 = vmatpush.msra.mxu1 %v63_v12 }
  0x27   :  { %217 = vmatpush.msra.mxu2 %v62_v13  ;;  %218 = vmatpush.msra.mxu3 %v62_v13 }
  0x28   :  { %89 = vmatpush.msra.mxu0 %v62_v13  ;;  %216 = vmatpush.msra.mxu1 %v62_v13 }
  0x29   :  { %220 = vmatpush.msra.mxu2 %v61_v14  ;;  %221 = vmatpush.msra.mxu3 %v61_v14 }
  0x2a   :  { %90 = vmatpush.msra.mxu0 %v61_v14  ;;  %219 = vmatpush.msra.mxu1 %v61_v14 }
  0x2b   :  { %223 = vmatpush.msra.mxu2 %v60_v15  ;;  %224 = vmatpush.msra.mxu3 %v60_v15 }
  0x2c   :  { %116 = vmatmul.f32.vlgmr.msra.gmra.mxu2 %v52_v16  ;;  %128 = vmatmul.f32.vlgmr.msra.gmra.mxu3 %v56_v17 }
  0x2d   :  { %91 = vmatpush.msra.mxu0 %v60_v15  ;;  %222 = vmatpush.msra.mxu1 %v60_v15 }
  0x2e   :  { %92 = vmatmul.f32.vlgmr.msra.gmra.mxu0 %v44_v18  ;;  %104 = vmatmul.f32.vlgmr.msra.gmra.mxu1 %v48_v19 }
  0x34   :  { %119 = vmatmul.f32.gmra.mxu2 %v53_v20  ;;  %131 = vmatmul.f32.gmra.mxu3 %v57_v21 }
  0x36   :  { %95 = vmatmul.f32.gmra.mxu0 %v45_v22  ;;  %107 = vmatmul.f32.gmra.mxu1 %v49_v23 }
  0x3c   :  { %122 = vmatmul.f32.gmra.mxu2 %v54_v24  ;;  %134 = vmatmul.f32.gmra.mxu3 %v58_v25 }
  0x3e   :  { %98 = vmatmul.f32.gmra.mxu0 %v46_v26  ;;  %110 = vmatmul.f32.gmra.mxu1 %v50_v27 }
  0x44   :  { %125 = vmatmul.f32.gmra.mxu2 %v55_v28  ;;  %137 = vmatmul.f32.gmra.mxu3 %v59_v29 }
  0x46   :  { %101 = vmatmul.f32.gmra.mxu0 %v47_v30  ;;  %113 = vmatmul.f32.gmra.mxu1 %v51_v31 }
  0xab   :  { %v93_v32 = vpop.f32.mrf.mxu0  ;;  %v105_v33 = vpop.f32.mrf.mxu1 }
  0xac   :  { %v94_v34 = vadd.f32 128.0, %v93_v32  ;;  %v106_v35 = vadd.f32 128.0, %v105_v33 }
  0xae   :  { %141 = vst [vmem:[#allocation7] sm:$0xff] %v94_v34 }
  0xaf   :  { %145 = vst [vmem:[#allocation7 + $0x20] sm:$0xff] %v106_v35  ;;  %v117_v36 = vpop.f32.mrf.mxu2  ;;  %v129_v37 = vpop.f32.mrf.mxu3 }
  0xb0   :  { %v118_v38 = vadd.f32 128.0, %v117_v36  ;;  %v130_v39 = vadd.f32 128.0, %v129_v37 }
  0xb2   :  { %149 = vst [vmem:[#allocation7 + $0x40] sm:$0xff] %v118_v38 }
  0xb3   :  { %153 = vst [vmem:[#allocation7 + $0x60] sm:$0xff] %v130_v39  ;;  %v96_v40 = vpop.f32.mrf.mxu0  ;;  %v108_v41 = vpop.f32.mrf.mxu1 }
  0xb4   :  { %v97_v42 = vadd.f32 128.0, %v96_v40  ;;  %v109_v43 = vadd.f32 128.0, %v108_v41 }
  0xb6   :  { %142 = vst [vmem:[#allocation7 + $0x8] sm:$0xff] %v97_v42 }
  0xb7   :  { %146 = vst [vmem:[#allocation7 + $0x28] sm:$0xff] %v109_v43  ;;  %v120_v44 = vpop.f32.mrf.mxu2  ;;  %v132_v45 = vpop.f32.mrf.mxu3 }
  0xb8   :  { %v121_v46 = vadd.f32 128.0, %v120_v44  ;;  %v133_v47 = vadd.f32 128.0, %v132_v45 }
  0xba   :  { %150 = vst [vmem:[#allocation7 + $0x48] sm:$0xff] %v121_v46 }
  0xbb   :  { %154 = vst [vmem:[#allocation7 + $0x68] sm:$0xff] %v133_v47  ;;  %v99_v48 = vpop.f32.mrf.mxu0  ;;  %v111_v49 = vpop.f32.mrf.mxu1 }
  0xbc   :  { %v100_v50 = vadd.f32 128.0, %v99_v48  ;;  %v112_v51 = vadd.f32 128.0, %v111_v49 }
  0xbe   :  { %143 = vst [vmem:[#allocation7 + $0x10] sm:$0xff] %v100_v50 }
  0xbf   :  { %147 = vst [vmem:[#allocation7 + $0x30] sm:$0xff] %v112_v51  ;;  %v123_v52 = vpop.f32.mrf.mxu2  ;;  %v135_v53 = vpop.f32.mrf.mxu3 }
  0xc0   :  { %v124_v54 = vadd.f32 128.0, %v123_v52  ;;  %v136_v55 = vadd.f32 128.0, %v135_v53 }
  0xc2   :  { %151 = vst [vmem:[#allocation7 + $0x50] sm:$0xff] %v124_v54 }
  0xc3   :  { %155 = vst [vmem:[#allocation7 + $0x70] sm:$0xff] %v136_v55  ;;  %v102_v56 = vpop.f32.mrf.mxu0  ;;  %v114_v57 = vpop.f32.mrf.mxu1 }
  0xc4   :  { %v103_v58 = vadd.f32 128.0, %v102_v56  ;;  %v115_v59 = vadd.f32 128.0, %v114_v57 }
  0xc6   :  { %144 = vst [vmem:[#allocation7 + $0x18] sm:$0xff] %v103_v58 }
  0xc7   :  { %148 = vst [vmem:[#allocation7 + $0x38] sm:$0xff] %v115_v59  ;;  %v126_v60 = vpop.f32.mrf.mxu2  ;;  %v138_v61 = vpop.f32.mrf.mxu3 }
  0xc8   :  { %v127_v62 = vadd.f32 128.0, %v126_v60  ;;  %v139_v63 = vadd.f32 128.0, %v138_v61 }
  0xca   :  { %152 = vst [vmem:[#allocation7 + $0x58] sm:$0xff] %v127_v62 }
  0xcb   :  { %156 = vst [vmem:[#allocation7 + $0x78] sm:$0xff] %v139_v63 }
  0xcc   :  { %169 = dma.vmem_to_hbm [thread:$0]  %s162_s1, 2048, %s164_s23, [#allocation4], %s309_s17, %s309_s17, %s310_s18  }
  0xcd   :  { %306 = dma.done.wait [#allocation4], 2048  }
  0xce   :  { %307 = vsyncadd [#allocation4], 4294965248 }
  0xcf   :  { %174 = vsyncpa [#allocation3], 1 }
  0xd0   :  { %175 = vsyncpa [#allocation6], 1 }
  0xd1   :  { %176 = vsyncpa [#allocation4], 1 }

</bundles_post_ra>
